<compile_context>
chip_gen: v7x
topology: tpu7x:2x2x1
jax: 0.10.0
libtpu: 0.0.40
codegen_flags: <defaults>
</compile_context>

<pallas_src>
import functools
import math

import jax
import jax.numpy as jnp
from jax.experimental import pallas as pl
from jax.experimental.pallas import tpu as pltpu

LANE = 128
_MAX_BLOCK_ROWS = 2048  # 2048 * 128 * 4 B = 1 MiB per f32 input block


def _largest_divisor_leq(n, cap):
    cap = max(1, min(n, cap))
    for d in range(cap, 0, -1):
        if n % d == 0:
            return d
    return 1


def _bce_dice_kernel(x_ref, t_ref, out_ref, acc_bce, acc_pt, acc_den,
                     *, t_off, m_per):
    g = pl.program_id(0)
    n = pl.program_id(2)
    s = pl.program_id(3)
    first = (n == 0) & (s == 0)
    last = (n == pl.num_programs(2) - 1) & (s == pl.num_programs(3) - 1)

    nb, rows, lane = x_ref.shape

    @pl.when(first)
    def _init():
        acc_bce[...] = jnp.zeros_like(acc_bce)
        acc_pt[...] = jnp.zeros_like(acc_pt)
        acc_den[...] = jnp.zeros_like(acc_den)

    x = x_ref[...].astype(jnp.float32)   # (Nb, rows, 128) logits
    t = t_ref[...].astype(jnp.float32)   # (Nb, rows, 128) targets

    # Element-validity mask: global flat spatial index < true spatial size.
    # Handles both the lane-padding tail and a non-divisible last row tile;
    # all-true (cheap VPU filler) when the spatial size tiles exactly.
    base = (g * t_off + s) * (rows * LANE)
    row_i = jax.lax.broadcasted_iota(jnp.int32, (nb, rows, lane), 1)
    lane_i = jax.lax.broadcasted_iota(jnp.int32, (nb, rows, lane), 2)
    valid = (base + row_i * LANE + lane_i) < m_per

    # Shared tanh: p = sigmoid(x) = 0.5 + 0.5*tanh(x/2), and the stable
    # BCE-with-logits  max(x,0) - x*t + log1p(exp(-|x|))
    #                = max(x,0) - x*t - log(sigmoid(|x|)).
    th = jnp.tanh(0.5 * x)
    p = 0.5 + 0.5 * th
    bce = jnp.maximum(x, 0.0) - x * t - jnp.log(0.5 + 0.5 * jnp.abs(th))

    zero = jnp.zeros_like(x)
    acc_bce[...] += jnp.where(valid, bce, zero)
    acc_pt[...] += jnp.where(valid, p * t, zero)
    acc_den[...] += jnp.where(valid, p * p + t * t, zero)

    @pl.when(last)
    def _finalize():
        s_pt = jnp.sum(acc_pt[...])
        s_den = jnp.sum(acc_den[...])
        s_bce = jnp.sum(acc_bce[...])
        row = jax.lax.broadcasted_iota(jnp.int32, (8, LANE), 0)
        out_ref[...] = jnp.where(row == 0, s_pt,
                                 jnp.where(row == 1, s_den,
                                           jnp.where(row == 2, s_bce, 0.0)))


def bce_dice_loss(x, target, *, alpha, beta, eps=1e-6):
    """x, target: (N, C, *spatial) arrays (NCHW / NCDHW); x holds logits."""
    assert x.shape == target.shape, "'input' and 'target' must have the same shape"
    N, C = x.shape[:2]
    m_per = math.prod(x.shape[2:])

    # Consume NCHW directly: contiguous reshapes only, no transpose pass.
    xr = x.reshape(N, C, m_per)
    tr = target.reshape(N, C, m_per)

    # Lane reshape needs the flat spatial size to be a multiple of 128; pad
    # only in that rare case (values are discarded by the in-kernel mask).
    m_pad = ((m_per + LANE - 1) // LANE) * LANE
    if m_pad != m_per:
        pad = ((0, 0), (0, 0), (0, m_pad - m_per))
        xr = jnp.pad(xr, pad)
        tr = jnp.pad(tr, pad)

    r_total = m_pad // LANE
    xv = xr.reshape(N, C, r_total, LANE)
    tv = tr.reshape(N, C, r_total, LANE)

    # ----- tiling plan ------------------------------------------------------
    rows = r_total if r_total <= _MAX_BLOCK_ROWS else _MAX_BLOCK_ROWS
    n_tiles = pl.cdiv(r_total, rows)          # spatial tiles per (n, c) slice

    # Megacore split (v7x: 2 TCs). Prefer splitting the spatial-tile axis,
    # else the batch axis, else G=1 (channel axis is also "parallel", so the
    # compiler may still split there).
    if n_tiles % 2 == 0:
        G, t_per, t_off = 2, n_tiles // 2, n_tiles // 2
        nb = _largest_divisor_leq(N, _MAX_BLOCK_ROWS // rows)
        nblk, n_off = N // nb, 0
    elif N % 2 == 0:
        G, t_per, t_off = 2, n_tiles, 0
        half = N // 2
        nb = _largest_divisor_leq(half, _MAX_BLOCK_ROWS // rows)
        nblk, n_off = half // nb, half // nb
    else:
        G, t_per, t_off = 1, n_tiles, 0
        nb = _largest_divisor_leq(N, _MAX_BLOCK_ROWS // rows)
        nblk, n_off = N // nb, 0

    kernel = functools.partial(_bce_dice_kernel, t_off=t_off, m_per=m_per)

    def in_map(g, c, n, t):
        return (g * n_off + n, c, g * t_off + t, 0)

    parts = pl.pallas_call(
        kernel,
        out_shape=jax.ShapeDtypeStruct((G, C, 8, LANE), jnp.float32),
        grid_spec=pltpu.PrefetchScalarGridSpec(
            num_scalar_prefetch=0,
            grid=(G, C, nblk, t_per),
            in_specs=[
                pl.BlockSpec((nb, None, rows, LANE), in_map),
                pl.BlockSpec((nb, None, rows, LANE), in_map),
            ],
            out_specs=pl.BlockSpec((None, None, 8, LANE),
                                   lambda g, c, n, t: (g, c, 0, 0)),
            scratch_shapes=[
                pltpu.VMEM((nb, rows, LANE), jnp.float32),   # acc_bce
                pltpu.VMEM((nb, rows, LANE), jnp.float32),   # acc_pt
                pltpu.VMEM((nb, rows, LANE), jnp.float32),   # acc_den (p*p + t*t)
            ],
        ),
        compiler_params=pltpu.CompilerParams(
            dimension_semantics=("parallel", "parallel", "arbitrary", "arbitrary")),
    )(xv, tv)

    # Tiny cross-core / per-channel reduction in the wrapper.
    pt_c = jnp.sum(parts[:, :, 0, 0], axis=0)        # (C,)  sum(p*t)
    den_c = jnp.sum(parts[:, :, 1, 0], axis=0)       # (C,)  sum(p*p + t*t)
    bce_sum = jnp.sum(parts[:, :, 2, 0])             # total BCE sum
    dice_mean = jnp.mean(2.0 * pt_c / jnp.maximum(den_c, float(eps)))
    bce_mean = bce_sum / float(N * C * m_per)        # true element count
    return alpha * bce_mean + beta * dice_mean


def _reference_loss(x, t, alpha, beta, eps=1e-6):
    """Pure-JAX reimplementation of the PyTorch BCEDiceLoss forward."""
    bce = jnp.maximum(x, 0.0) - x * t + jnp.log1p(jnp.exp(-jnp.abs(x)))
    bce_mean = jnp.mean(bce)
    p = jax.nn.sigmoid(x)
    C = x.shape[1]
    pf = jnp.moveaxis(p, 1, 0).reshape(C, -1)
    tf = jnp.moveaxis(t, 1, 0).reshape(C, -1)
    intersect = jnp.sum(pf * tf, axis=-1)
    denom = jnp.maximum(jnp.sum(pf * pf, axis=-1) + jnp.sum(tf * tf, axis=-1), eps)
    dice = jnp.mean(2.0 * intersect / denom)
    return alpha * bce_mean + beta * dice


if __name__ == "__main__":
    key = jax.random.PRNGKey(0)
    kx, kt = jax.random.split(key)

    N, C, H, W = 2, 4, 16, 16
    x = jax.random.normal(kx, (N, C, H, W), dtype=jnp.float32)               # logits
    target = jax.random.bernoulli(kt, 0.5, (N, C, H, W)).astype(jnp.float32)

    alpha, beta = 0.7, 0.3

    loss = bce_dice_loss(x, target, alpha=alpha, beta=beta)
    loss = jax.block_until_ready(loss)

    ref = _reference_loss(x, target, alpha, beta)
    assert jnp.allclose(loss, ref, rtol=1e-5, atol=1e-5), (loss, ref)
    print("KERNEL_OK")
</pallas_src>

<mosaic_0001>
module attributes {stable_mosaic.version = 11 : i64} {
  func.func @_bce_dice_kernel(%arg0: i32, %arg1: i32, %arg2: i32, %arg3: i32, %arg4: memref<1x1x2x128xf32, #tpu.memory_space<vmem>>, %arg5: memref<1x1x2x128xf32, #tpu.memory_space<vmem>>, %arg6: memref<1x1x8x128xf32, #tpu.memory_space<vmem>>, %arg7: memref<1x2x128xf32, #tpu.memory_space<vmem>>, %arg8: memref<1x2x128xf32, #tpu.memory_space<vmem>>, %arg9: memref<1x2x128xf32, #tpu.memory_space<vmem>>) attributes {dimension_semantics = [#tpu.dimension_semantics<parallel>, #tpu.dimension_semantics<parallel>, #tpu.dimension_semantics<arbitrary>, #tpu.dimension_semantics<arbitrary>], iteration_bounds = array<i64: 2, 4, 1, 1>, scalar_prefetch = 0 : i64, scratch_operands = 3 : i64, tpu.core_type = #tpu.core_type<tc>, window_params = [{transform_indices = @transform_0, window_bounds = array<i64: 1, 1, 2, 128>}, {transform_indices = @transform_1, window_bounds = array<i64: 1, 1, 2, 128>}, {transform_indices = @transform_2, window_bounds = array<i64: 1, 1, 8, 128>}]} {
    %c0_i32 = arith.constant 0 : i32
    %0 = arith.cmpi eq, %arg2, %c0_i32 : i32
    %c0_i32_0 = arith.constant 0 : i32
    %1 = arith.cmpi eq, %arg3, %c0_i32_0 : i32
    %2 = arith.andi %0, %1 : i1
    %c0_i32_1 = arith.constant 0 : i32
    %3 = arith.cmpi eq, %arg2, %c0_i32_1 : i32
    %c0_i32_2 = arith.constant 0 : i32
    %4 = arith.cmpi eq, %arg3, %c0_i32_2 : i32
    %5 = arith.andi %3, %4 : i1
    %6 = arith.extui %2 : i1 to i32
    %c0_i32_3 = arith.constant 0 : i32
    %7 = arith.cmpi ne, %6, %c0_i32_3 : i32
    scf.if %7 {
      %cst_38 = arith.constant 0.000000e+00 : f32
      %61 = vector.broadcast %cst_38 : f32 to vector<1x2x128xf32>
      %c0_39 = arith.constant 0 : index
      %c0_40 = arith.constant 0 : index
      %c0_41 = arith.constant 0 : index
      %62 = vector.load %arg7[%c0_39, %c0_40, %c0_41] : memref<1x2x128xf32, #tpu.memory_space<vmem>>, vector<1x2x128xf32>
      tpu.vector_store %arg7[%c0_39, %c0_40, %c0_41], %61 {strides = array<i32>} : memref<1x2x128xf32, #tpu.memory_space<vmem>>, vector<1x2x128xf32>,
      %cst_42 = arith.constant 0.000000e+00 : f32
      %63 = vector.broadcast %cst_42 : f32 to vector<1x2x128xf32>
      %c0_43 = arith.constant 0 : index
      %c0_44 = arith.constant 0 : index
      %c0_45 = arith.constant 0 : index
      %64 = vector.load %arg8[%c0_43, %c0_44, %c0_45] : memref<1x2x128xf32, #tpu.memory_space<vmem>>, vector<1x2x128xf32>
      tpu.vector_store %arg8[%c0_43, %c0_44, %c0_45], %63 {strides = array<i32>} : memref<1x2x128xf32, #tpu.memory_space<vmem>>, vector<1x2x128xf32>,
      %cst_46 = arith.constant 0.000000e+00 : f32
      %65 = vector.broadcast %cst_46 : f32 to vector<1x2x128xf32>
      %c0_47 = arith.constant 0 : index
      %c0_48 = arith.constant 0 : index
      %c0_49 = arith.constant 0 : index
      %66 = vector.load %arg9[%c0_47, %c0_48, %c0_49] : memref<1x2x128xf32, #tpu.memory_space<vmem>>, vector<1x2x128xf32>
      tpu.vector_store %arg9[%c0_47, %c0_48, %c0_49], %65 {strides = array<i32>} : memref<1x2x128xf32, #tpu.memory_space<vmem>>, vector<1x2x128xf32>,
    } else {
    }
    %c0 = arith.constant 0 : index
    %c0_4 = arith.constant 0 : index
    %c0_5 = arith.constant 0 : index
    %c0_6 = arith.constant 0 : index
    %8 = vector.load %arg4[%c0, %c0_4, %c0_5, %c0_6] : memref<1x1x2x128xf32, #tpu.memory_space<vmem>>, vector<1x1x2x128xf32>
    %9 = vector.shape_cast %8 : vector<1x1x2x128xf32> to vector<1x2x128xf32>
    %c0_7 = arith.constant 0 : index
    %c0_8 = arith.constant 0 : index
    %c0_9 = arith.constant 0 : index
    %c0_10 = arith.constant 0 : index
    %10 = vector.load %arg5[%c0_7, %c0_8, %c0_9, %c0_10] : memref<1x1x2x128xf32, #tpu.memory_space<vmem>>, vector<1x1x2x128xf32>
    %11 = vector.shape_cast %10 : vector<1x1x2x128xf32> to vector<1x2x128xf32>
    %c0_i32_11 = arith.constant 0 : i32
    %12 = arith.muli %arg0, %c0_i32_11 : i32
    %13 = arith.addi %12, %arg3 : i32
    %c256_i32 = arith.constant 256 : i32
    %14 = arith.muli %13, %c256_i32 : i32
    %15 = tpu.iota {dimensions = array<i32: 1>} : vector<1x2x128xi32>
    %16 = tpu.iota {dimensions = array<i32: 2>} : vector<1x2x128xi32>
    %c128_i32 = arith.constant 128 : i32
    %17 = vector.broadcast %c128_i32 : i32 to vector<1x2x128xi32>
    %18 = arith.muli %15, %17 : vector<1x2x128xi32>
    %19 = vector.broadcast %14 : i32 to vector<1x2x128xi32>
    %20 = arith.addi %19, %18 : vector<1x2x128xi32>
    %21 = arith.addi %20, %16 : vector<1x2x128xi32>
    %c256_i32_12 = arith.constant 256 : i32
    %22 = vector.broadcast %c256_i32_12 : i32 to vector<1x2x128xi32>
    %23 = arith.cmpi slt, %21, %22 : vector<1x2x128xi32>
    %cst = arith.constant 5.000000e-01 : f32
    %24 = vector.broadcast %cst : f32 to vector<1x2x128xf32>
    %25 = arith.mulf %24, %9 : vector<1x2x128xf32>
    %26 = math.tanh %25 : vector<1x2x128xf32>
    %cst_13 = arith.constant 5.000000e-01 : f32
    %27 = vector.broadcast %cst_13 : f32 to vector<1x2x128xf32>
    %28 = arith.mulf %27, %26 : vector<1x2x128xf32>
    %cst_14 = arith.constant 5.000000e-01 : f32
    %29 = vector.broadcast %cst_14 : f32 to vector<1x2x128xf32>
    %30 = arith.addf %29, %28 : vector<1x2x128xf32>
    %cst_15 = arith.constant 0.000000e+00 : f32
    %31 = vector.broadcast %cst_15 : f32 to vector<1x2x128xf32>
    %32 = arith.maximumf %9, %31 : vector<1x2x128xf32>
    %33 = arith.mulf %9, %11 : vector<1x2x128xf32>
    %34 = arith.subf %32, %33 : vector<1x2x128xf32>
    %35 = math.absf %26 : vector<1x2x128xf32>
    %cst_16 = arith.constant 5.000000e-01 : f32
    %36 = vector.broadcast %cst_16 : f32 to vector<1x2x128xf32>
    %37 = arith.mulf %36, %35 : vector<1x2x128xf32>
    %cst_17 = arith.constant 5.000000e-01 : f32
    %38 = vector.broadcast %cst_17 : f32 to vector<1x2x128xf32>
    %39 = arith.addf %38, %37 : vector<1x2x128xf32>
    %40 = math.log %39 : vector<1x2x128xf32>
    %41 = arith.subf %34, %40 : vector<1x2x128xf32>
    %cst_18 = arith.constant 0.000000e+00 : f32
    %42 = vector.broadcast %cst_18 : f32 to vector<1x2x128xf32>
    %c0_19 = arith.constant 0 : index
    %c0_20 = arith.constant 0 : index
    %c0_21 = arith.constant 0 : index
    %43 = vector.load %arg7[%c0_19, %c0_20, %c0_21] : memref<1x2x128xf32, #tpu.memory_space<vmem>>, vector<1x2x128xf32>
    %44 = arith.select %23, %41, %42 : vector<1x2x128xi1>, vector<1x2x128xf32>
    %45 = arith.addf %43, %44 : vector<1x2x128xf32>
    %c0_22 = arith.constant 0 : index
    %c0_23 = arith.constant 0 : index
    %c0_24 = arith.constant 0 : index
    %46 = vector.load %arg7[%c0_22, %c0_23, %c0_24] : memref<1x2x128xf32, #tpu.memory_space<vmem>>, vector<1x2x128xf32>
    tpu.vector_store %arg7[%c0_22, %c0_23, %c0_24], %45 {strides = array<i32>} : memref<1x2x128xf32, #tpu.memory_space<vmem>>, vector<1x2x128xf32>,
    %c0_25 = arith.constant 0 : index
    %c0_26 = arith.constant 0 : index
    %c0_27 = arith.constant 0 : index
    %47 = vector.load %arg8[%c0_25, %c0_26, %c0_27] : memref<1x2x128xf32, #tpu.memory_space<vmem>>, vector<1x2x128xf32>
    %48 = arith.mulf %30, %11 : vector<1x2x128xf32>
    %49 = arith.select %23, %48, %42 : vector<1x2x128xi1>, vector<1x2x128xf32>
    %50 = arith.addf %47, %49 : vector<1x2x128xf32>
    %c0_28 = arith.constant 0 : index
    %c0_29 = arith.constant 0 : index
    %c0_30 = arith.constant 0 : index
    %51 = vector.load %arg8[%c0_28, %c0_29, %c0_30] : memref<1x2x128xf32, #tpu.memory_space<vmem>>, vector<1x2x128xf32>
    tpu.vector_store %arg8[%c0_28, %c0_29, %c0_30], %50 {strides = array<i32>} : memref<1x2x128xf32, #tpu.memory_space<vmem>>, vector<1x2x128xf32>,
    %c0_31 = arith.constant 0 : index
    %c0_32 = arith.constant 0 : index
    %c0_33 = arith.constant 0 : index
    %52 = vector.load %arg9[%c0_31, %c0_32, %c0_33] : memref<1x2x128xf32, #tpu.memory_space<vmem>>, vector<1x2x128xf32>
    %53 = arith.mulf %30, %30 : vector<1x2x128xf32>
    %54 = arith.mulf %11, %11 : vector<1x2x128xf32>
    %55 = arith.addf %53, %54 : vector<1x2x128xf32>
    %56 = arith.select %23, %55, %42 : vector<1x2x128xi1>, vector<1x2x128xf32>
    %57 = arith.addf %52, %56 : vector<1x2x128xf32>
    %c0_34 = arith.constant 0 : index
    %c0_35 = arith.constant 0 : index
    %c0_36 = arith.constant 0 : index
    %58 = vector.load %arg9[%c0_34, %c0_35, %c0_36] : memref<1x2x128xf32, #tpu.memory_space<vmem>>, vector<1x2x128xf32>
    tpu.vector_store %arg9[%c0_34, %c0_35, %c0_36], %57 {strides = array<i32>} : memref<1x2x128xf32, #tpu.memory_space<vmem>>, vector<1x2x128xf32>,
    %59 = arith.extui %5 : i1 to i32
    %c0_i32_37 = arith.constant 0 : i32
    %60 = arith.cmpi ne, %59, %c0_i32_37 : i32
    scf.if %60 {
      %c0_38 = arith.constant 0 : index
      %c0_39 = arith.constant 0 : index
      %c0_40 = arith.constant 0 : index
      %61 = vector.load %arg8[%c0_38, %c0_39, %c0_40] : memref<1x2x128xf32, #tpu.memory_space<vmem>>, vector<1x2x128xf32>
      %62 = vector.shape_cast %61 : vector<1x2x128xf32> to vector<1x1x2x128xf32>
      %cst_41 = arith.constant dense<0.000000e+00> : vector<1xf32>
      %63 = vector.multi_reduction <add>, %62, %cst_41 [1, 2, 3] : vector<1x1x2x128xf32> to vector<1xf32>
      %64 = vector.shape_cast %63 : vector<1xf32> to vector<1x1x1x1xf32>
      %65 = vector.extract %64[0, 0, 0, 0] : f32 from vector<1x1x1x1xf32>
      %c0_42 = arith.constant 0 : index
      %c0_43 = arith.constant 0 : index
      %c0_44 = arith.constant 0 : index
      %66 = vector.load %arg9[%c0_42, %c0_43, %c0_44] : memref<1x2x128xf32, #tpu.memory_space<vmem>>, vector<1x2x128xf32>
      %67 = vector.shape_cast %66 : vector<1x2x128xf32> to vector<1x1x2x128xf32>
      %cst_45 = arith.constant dense<0.000000e+00> : vector<1xf32>
      %68 = vector.multi_reduction <add>, %67, %cst_45 [1, 2, 3] : vector<1x1x2x128xf32> to vector<1xf32>
      %69 = vector.shape_cast %68 : vector<1xf32> to vector<1x1x1x1xf32>
      %70 = vector.extract %69[0, 0, 0, 0] : f32 from vector<1x1x1x1xf32>
      %c0_46 = arith.constant 0 : index
      %c0_47 = arith.constant 0 : index
      %c0_48 = arith.constant 0 : index
      %71 = vector.load %arg7[%c0_46, %c0_47, %c0_48] : memref<1x2x128xf32, #tpu.memory_space<vmem>>, vector<1x2x128xf32>
      %72 = vector.shape_cast %71 : vector<1x2x128xf32> to vector<1x1x2x128xf32>
      %cst_49 = arith.constant dense<0.000000e+00> : vector<1xf32>
      %73 = vector.multi_reduction <add>, %72, %cst_49 [1, 2, 3] : vector<1x1x2x128xf32> to vector<1xf32>
      %74 = vector.shape_cast %73 : vector<1xf32> to vector<1x1x1x1xf32>
      %75 = vector.extract %74[0, 0, 0, 0] : f32 from vector<1x1x1x1xf32>
      %76 = tpu.iota {dimensions = array<i32: 0>} : vector<8x128xi32>
      %c0_i32_50 = arith.constant 0 : i32
      %77 = vector.broadcast %c0_i32_50 : i32 to vector<8x128xi32>
      %78 = arith.cmpi eq, %76, %77 : vector<8x128xi32>
      %c1_i32 = arith.constant 1 : i32
      %79 = vector.broadcast %c1_i32 : i32 to vector<8x128xi32>
      %80 = arith.cmpi eq, %76, %79 : vector<8x128xi32>
      %c2_i32 = arith.constant 2 : i32
      %81 = vector.broadcast %c2_i32 : i32 to vector<8x128xi32>
      %82 = arith.cmpi eq, %76, %81 : vector<8x128xi32>
      %cst_51 = arith.constant 0.000000e+00 : f32
      %83 = vector.broadcast %75 : f32 to vector<8x128xf32>
      %84 = vector.broadcast %cst_51 : f32 to vector<8x128xf32>
      %85 = arith.select %82, %83, %84 : vector<8x128xi1>, vector<8x128xf32>
      %86 = vector.broadcast %70 : f32 to vector<8x128xf32>
      %87 = arith.select %80, %86, %85 : vector<8x128xi1>, vector<8x128xf32>
      %88 = vector.broadcast %65 : f32 to vector<8x128xf32>
      %89 = arith.select %78, %88, %87 : vector<8x128xi1>, vector<8x128xf32>
      %c0_52 = arith.constant 0 : index
      %c0_53 = arith.constant 0 : index
      %c0_54 = arith.constant 0 : index
      %c0_55 = arith.constant 0 : index
      %90 = vector.load %arg6[%c0_52, %c0_53, %c0_54, %c0_55] : memref<1x1x8x128xf32, #tpu.memory_space<vmem>>, vector<1x1x8x128xf32>
      %91 = vector.shape_cast %90 : vector<1x1x8x128xf32> to vector<8x128xf32>
      %92 = vector.shape_cast %89 : vector<8x128xf32> to vector<1x1x8x128xf32>
      tpu.vector_store %arg6[%c0_52, %c0_53, %c0_54, %c0_55], %92 {strides = array<i32>} : memref<1x1x8x128xf32, #tpu.memory_space<vmem>>, vector<1x1x8x128xf32>,
    } else {
    }
    return
  }
  func.func @transform_0(%arg0: i32, %arg1: i32, %arg2: i32, %arg3: i32) -> (i32, i32, i32, i32) {
    %c1_i32 = arith.constant 1 : i32
    %0 = arith.muli %arg0, %c1_i32 : i32
    %1 = arith.addi %0, %arg2 : i32
    %c0_i32 = arith.constant 0 : i32
    %2 = arith.muli %arg0, %c0_i32 : i32
    %3 = arith.addi %2, %arg3 : i32
    %c0_i32_0 = arith.constant 0 : i32
    %c0_i32_1 = arith.constant 0 : i32
    return %1, %arg1, %3, %c0_i32_0 : i32, i32, i32, i32
  }
  func.func @transform_1(%arg0: i32, %arg1: i32, %arg2: i32, %arg3: i32) -> (i32, i32, i32, i32) {
    %c1_i32 = arith.constant 1 : i32
    %0 = arith.muli %arg0, %c1_i32 : i32
    %1 = arith.addi %0, %arg2 : i32
    %c0_i32 = arith.constant 0 : i32
    %2 = arith.muli %arg0, %c0_i32 : i32
    %3 = arith.addi %2, %arg3 : i32
    %c0_i32_0 = arith.constant 0 : i32
    %c0_i32_1 = arith.constant 0 : i32
    return %1, %arg1, %3, %c0_i32_0 : i32, i32, i32, i32
  }
  func.func @transform_2(%arg0: i32, %arg1: i32, %arg2: i32, %arg3: i32) -> (i32, i32, i32, i32) {
    %c0_i32 = arith.constant 0 : i32
    %c0_i32_0 = arith.constant 0 : i32
    %c0_i32_1 = arith.constant 0 : i32
    return %arg0, %arg1, %c0_i32, %c0_i32_0 : i32, i32, i32, i32
  }
}

</mosaic_0001>

<bundles_post_ra>
// kernel: tpu_custom_call.1
= control target key start
LH: loop header
LB: loop body
LE: loop exit
PB: predicated region body
PF: predicated region fallthrough
CT: control target
= control target key end

     0   :  { %7 = vsyncpa [#allocation6], 0  ;;  %s1032_s0 = inlined_call_operand.hbm [shape: f32[2,4,2,128], index: 0, kind: input, shape index: {}]   ;;  %s1033_s1 = inlined_call_operand.hbm [shape: f32[2,4,2,128], index: 1, kind: input, shape index: {}]   ;;  %s1034_s2 = inlined_call_operand.hbm [shape: f32[2,4,8,128], index: 2, kind: output, shape index: {}]  }
   0x1   :  { %9 = vsyncpa [#allocation6 + $0x1], 0 }
   0x2   :  { %10 = vsyncpa [#allocation9], 0 }
   0x3   :  { %12 = vsyncpa [#allocation9 + $0x1], 0 }
   0x4   :  { %13 = vsyncpa [#allocation7], 0 }
   0x5   :  { %15 = vsyncpa [#allocation7 + $0x1], 0  ;;  %s774_s9 = smov 0   ;;  %s776_s10 = smov 0  }
   0x6   :  { %s778_s11 = smov 0   ;;  %s780_s12 = smov 0  }
   0x7   :  { %s782_s13 = smov 0   ;;  %s784_s14 = smov 0  }
   0x8   :  { %s786_s15 = smov 0   ;;  %s788_s16 = smov 0  }
   0x9 LB: > { %s478_s17 = sadd.s32 4294967295, %s753_s16   ;;  %s479_s18 = sadd.s32 4294967294, %s753_s16   ;;  %s753_s16 = sphi %s788_s16, %s21_s16   ;;  %s749_s15 = sphi %s786_s15, %s1057_s15   ;;  %s745_s14 = sphi %s784_s14, %s1056_s14   ;;  %s741_s13 = sphi %s782_s13, %s1055_s13   ;;  %s737_s12 = sphi %s780_s12, %s1054_s12   ;;  %s733_s11 = sphi %s778_s11, %s1053_s11   ;;  %s729_s10 = sphi %s776_s10, %s1052_s10   ;;  %s725_s9 = sphi %s774_s9, %s1051_s9  }
   0xa   : > { %s43_s19 = sadd.s32 1, %s745_s14  ;;  %s47_s20 = sadd.s32 1, %s749_s15 }
   0xb   : > { %p45_p0 = scmp.ge.s32.totalorder %s43_s19, 4  ;;  %s60_s21 = sadd.s32 1, %s733_s11 }
   0xc   : > { %p67_p1 = scmp.ne.s32.totalorder %s733_s11, %s729_s10  ;;  %p68_p2 = scmp.eq.s32.totalorder %s753_s16, 0 }
   0xd   : > { %s1059_s19 = smov (%p45_p0, %s43_s19), 0  ;;  %s1061_s20 = smov (!%p45_p0, %s47_s20), %s749_s15 }
   0xe   : > { %s54_s22 = ssub.s32 %s745_s14, %s1059_s19  ;;  %p827_p3 = por %p68_p2, %p67_p1 }
   0xf   : > { %p49_p4 = scmp.ge.s32.totalorder %s1061_s20, 2  ;;  %p73_p5 = scmp.ne.s32.totalorder %s729_s10, %s725_s9 }
  0x10   : > { %p74_p6 = scmp.eq.s32.totalorder %s478_s17, 0  ;;  %p131_p7 = scmp.eq.s32.totalorder %s478_s17, 7 }
  0x11   : > { %s1063_s20 = smov (%p49_p4, %s1061_s20), 0  ;;  %p137_p10 = scmp.eq.s32.totalorder %s479_s18, 7 }
  0x12   : > { %p835_p8 = por %p74_p6, %p73_p5  ;;  %p839_p9 = por %p131_p7, %p67_p1 }
  0x13   : > { %s53_s26 = ssub.s32 %s749_s15, %s1063_s20  ;;  %p845_p12 = por %p137_p10, %p73_p5 }
  0x14   : > { %s1039_s24 = scalar_select %p835_p8, 1, 0 }
  0x15   : > { %s1040_s25 = scalar_select %p839_p9, 1, 0 }
  0x16   : > { %s55_s27 = sor.u32 %s54_s22, %s53_s26  ;;  %p520_p13 = scmp.lt.s32.totalorder %s753_s16, 8 }
  0x17   : > { %p58_p11 = scmp.eq.s32.totalorder %s55_s27, 0  ;;  %s851_s29 = sand.u32 1, %s733_s11  }
  0x18   : > { %s1041_s28 = scalar_select %p845_p12, 1, 0 }
  0x19   : > { %s854_s30 = scalar_select %p58_p11, %s733_s11, %s60_s21  }
  0x1a   : > { %s1035_s3 = sshll.u32 %s851_s29, 1  ;;  %s483_s4 = sshll.u32 %s749_s15, 2 }
  0x1b   : > { %s859_s5 = sadd.s32 %s745_s14, %s483_s4  ;;  %s161_s6 = scalar_lea.vmem [#allocation5], %s1035_s3 }
  0x1c   : > { %s172_s7 = sshll.u32 %s161_s6, 4  ;;  %s484_s8 = sshll.u32 %s859_s5, 5  ;;  %s864_s7 = int_to_ptr.vmem [resolvable:$true] %s172_s7 }
  0x1d   : > { %s871_s22 = scalar_lea.hbm %s1032_s0, %s484_s8  ;;  %p875_p0 = pnand %p520_p13, %p827_p3 }
  0x1e   : > { %s158_s26 = scalar_lea.sflag [#allocation6], %s851_s29  ;;  %s591_s27 = scalar_lea.hbm %s871_s22, 32 }
  0x1f   : > { %p592_p4 = scmp.ne.s32.totalorder %s871_s22, %s591_s27  ;;  %p593_p5 = pneg %p875_p0 }
  0x20   : > { %s596_s6 = scalar_lea.hbm %s1032_s0, 256  ;;  %p597_p3 = scmp.lt.u32.totalorder %s871_s22, %s1032_s0 }
  0x21   : > { %p594_p6 = pnand %p593_p5, %p592_p4  ;;  %p598_p10 = scmp.lt.u32.totalorder %s596_s6, %s591_s27 }
  0x22   : > { %p600_p13 = scmp.lt.u32.totalorder %s591_s27, %s871_s22 }
  0x23   : > { %p595_p7 = pneg %p594_p6  ;;  %p599_p11 = por %p598_p10, %p597_p3 }
  0x25   : > { %p601_p1 = por %p600_p13, %p599_p11 }
  0x27   : > { %p602_p2 = pnand %p601_p1, %p595_p7 }
  0x29   : > { %605 = shalt.err (!%p602_p2)
}
  0x2a   : > { %s606_s3 = scalar_lea.vmem %s864_s7, 32  ;;  %s755_s23 = smov [#allocation5]  }
  0x2b   : > { %p607_p4 = scmp.ne.s32.totalorder %s864_s7, %s606_s3  ;;  %s611_s4 = sshll.u32 %s755_s23, 4  ;;  %s612_s4 = int_to_ptr.vmem [resolvable:$false] %s611_s4 }
  0x2c   : > { %s613_s17 = scalar_lea.vmem %s612_s4, 64  ;;  %p614_p9 = scmp.lt.s32.totalorder %s864_s7, %s612_s4 }
  0x2d   : > { %p609_p6 = pnand %p607_p4, %p593_p5  ;;  %p615_p3 = scmp.lt.s32.totalorder %s613_s17, %s606_s3 }
  0x2f   : > { %p610_p12 = pneg %p609_p6  ;;  %p616_p10 = por %p615_p3, %p614_p9 }
  0x31   : > { %p617_p11 = pnand %p616_p10, %p610_p12 }
  0x33   : > { %620 = shalt.err (!%p617_p11)
}
  0x34   : > { %512 = dma.hbm_to_vmem [thread:$0]  (!%p875_p0), %s871_s22, 32, %s864_s7, %s158_s26  }
  0x35   : > { %p1043_p1 = scmp.lt.s32.totalorder %s753_s16, 9  ;;  %p1044_p2 = scmp.ge.s32.totalorder %s753_s16, 1 }
  0x36   : > { %s920_s18 = scalar_lea.hbm %s1033_s1, %s484_s8  ;;  %s1046_s23 = sshll.u32 %s851_s29, 1 }
  0x37   : > { %p911_p7 = pnand %p1044_p2, %p1043_p1  ;;  %s183_s4 = scalar_lea.vmem [#allocation8], %s1046_s23 }
  0x38   : > { %s194_s17 = sshll.u32 %s183_s4, 4  ;;  %s180_s7 = scalar_lea.sflag [#allocation9], %s851_s29  ;;  %s195_s17 = int_to_ptr.vmem [resolvable:$true] %s194_s17 }
  0x39   : > { %s1045_s27 = scalar_select %p911_p7, 1, 0 }
  0x3a   : > { %s621_s22 = scalar_lea.hbm %s920_s18, 32  ;;  %s626_s8 = scalar_lea.hbm %s1033_s1, 256 }
  0x3b   : > { %p622_p9 = scmp.ne.s32.totalorder %s920_s18, %s621_s22  ;;  %p627_p4 = scmp.lt.u32.totalorder %s920_s18, %s1033_s1 }
  0x3c   : > { %p628_p6 = scmp.lt.u32.totalorder %s626_s8, %s621_s22  ;;  %p630_p10 = scmp.lt.u32.totalorder %s621_s22, %s920_s18 }
  0x3d   : > { %p624_p12 = pnand %p622_p9, %p593_p5 }
  0x3e   : > { %p629_p3 = por %p628_p6, %p627_p4 }
  0x3f   : > { %p625_p13 = pneg %p624_p12 }
  0x40   : > { %p631_p11 = por %p630_p10, %p629_p3 }
  0x42   : > { %p632_p1 = pnand %p631_p11, %p625_p13 }
  0x44   : > { %635 = shalt.err (!%p632_p1)
}
  0x45   : > { %s636_s29 = scalar_lea.vmem %s195_s17, 32  ;;  %s756_s23 = smov [#allocation8]  }
  0x46   : > { %p637_p2 = scmp.ne.s32.totalorder %s195_s17, %s636_s29  ;;  %s641_s4 = sshll.u32 %s756_s23, 4  ;;  %s642_s4 = int_to_ptr.vmem [resolvable:$false] %s641_s4 }
  0x47   : > { %s643_s5 = scalar_lea.vmem %s642_s4, 64  ;;  %p644_p8 = scmp.lt.s32.totalorder %s195_s17, %s642_s4 }
  0x48   : > { %p639_p9 = pnand %p637_p2, %p593_p5  ;;  %p645_p7 = scmp.lt.s32.totalorder %s643_s5, %s636_s29 }
  0x4a   : > { %p640_p12 = pneg %p639_p9  ;;  %p646_p4 = por %p645_p7, %p644_p8 }
  0x4c   : > { %p647_p6 = pnand %p646_p4, %p640_p12 }
  0x4e   : > { %650 = shalt.err (!%p647_p6)
}
  0x4f   : > { %515 = dma.hbm_to_vmem [thread:$0]  (!%p875_p0), %s920_s18, 32, %s195_s17, %s180_s7  }
  0x50   : > { %p1047_p13 = scmp.ne.s32.totalorder %s1045_s27, 0 }
  0x51   : > { %s947_s22 = sand.u32 (!%p1047_p13), 1, %s729_s10   ;;  %p1048_p5 = scmp.ne.s32.totalorder (!%p1047_p13), %s1039_s24, 0 }
  0x52   : > { %203 = sbr.rel (%p1047_p13) target bundleno = 361 (0x169), region = 28  ;;  %s489_s26 = sshll.u32 (!%p1047_p13), %s947_s22, 1 }
  0x53   : > { %s206_s8 = scalar_lea.sflag (!%p1047_p13), [#allocation6], %s947_s22  ;;  %s209_s3 = scalar_lea.vmem (!%p1047_p13), [#allocation5], %s489_s26 }
  0x59   : > { %712 = dma.done.wait (%p1048_p5), %s206_s8, 32  }
  0x5a   : > { %714 = vsyncadd (%p1048_p5), %s206_s8, 4294967264  ;;  %s215_s21 = scalar_lea.sflag [#allocation9], %s947_s22  ;;  %s218_s18 = scalar_lea.vmem [#allocation8], %s489_s26 }
  0x5b   : > { %716 = dma.done.wait (%p1048_p5), %s215_s21, 32  }
  0x5c   : > { %718 = vsyncadd (%p1048_p5), %s215_s21, 4294967264  ;;  %v757_v0 = vmov 0.0   ;;  %v255_v1 = vld [vmem:[%s209_s3] sm:$0x3]  ;;  %v258_v2 = vlaneseq  ;;  %v256_v11 = vld [vmem:[%s218_s18] sm:$0x3] }
  0x5d   : > { %253 = vst [vmem:[#allocation3] sm:$0x3] %v757_v0  ;;  %252 = vst [vmem:[#allocation2] sm:$0x3] %v757_v0  ;;  %v267_v3 = vmul.f32 0.5, %v255_v1  ;;  %v291_v13 = vmul.f32 %v256_v11, %v256_v11  ;;  %v271_v25 = vmax.f32 %v255_v1, 0.0  ;;  %v272_v26 = vmul.f32 %v256_v11, %v255_v1 }
  0x5e   : > { %254 = vst [vmem:[#allocation4] sm:$0x3] %v757_v0  ;;  %v960_v4 = vshrl.u32 %v258_v2, 7  ;;  %v261_v5 = vand.u32 127, %v258_v2  ;;  %vm299_vm1 = vcmask 1041408   ;;  %s493_s24 = sshll.u32 %s741_s13, 2 }
  0x5f   : > { %587 = vtanh.f32 %v267_v3  ;;  %v273_v27 = vsub.f32 %v271_v25, %v272_v26  ;;  %s491_s27 = sshll.u32 %s947_s22, 3  ;;  %s354_s17 = sadd.s32 %s737_s12, %s493_s24 }
  0x60   : > { %v262_v6 = vmul.u32 128, %v960_v4  ;;  %vm334_vm2 = vcmp.eq.s32.totalorder %v960_v4, 2  ;;  %s494_s29 = sshll.u32 %s354_s17, 7  ;;  %vm333_vm3 = vcmp.eq.s32.totalorder %v960_v4, 1  ;;  %s243_s4 = scalar_lea.vmem [#allocation10], %s491_s27  ;;  %vm332_vm4 = vcmp.eq.s32.totalorder %v960_v4, 0 }
  0x61   : > { %s358_s5 = sshll.u32 %s243_s4, 4  ;;  %s978_s26 = scalar_lea.hbm %s1034_s2, %s494_s29  ;;  %s980_s5 = int_to_ptr.vmem [resolvable:$true] %s358_s5 }
  0x62   : > { %v265_v8 = vadd.s32 %v262_v6, %v261_v5  ;;  %s343_s8 = scalar_lea.sflag [#allocation7], %s947_s22  ;;  %s651_s3 = scalar_lea.vmem %s980_s5, 128 }
  0x63   : > { %p652_p8 = scmp.ne.s32.totalorder %s980_s5, %s651_s3  ;;  %p1049_p0 = scmp.ne.s32.totalorder %s1040_s25, 0 }
  0x64   : > { %vm266_vm0 = vcmp.lt.s32.totalorder %v265_v8, 256  ;;  %v284_v15 = vld [vmem:[#allocation3] sm:$0x3]  ;;  %v280_v35 = vld [vmem:[#allocation2] sm:$0x3]  ;;  %s758_s21 = smov [#allocation10]  }
  0x65   : > { %v289_v20 = vld [vmem:[#allocation4] sm:$0x3]  ;;  %p653_p7 = pnand %p652_p8, %p1049_p0  ;;  %s655_s18 = sshll.u32 %s758_s21, 4  ;;  %s656_s18 = int_to_ptr.vmem [resolvable:$false] %s655_s18 }
  0x66   : > { %s657_s24 = scalar_lea.vmem %s656_s18, 256  ;;  %p658_p10 = scmp.lt.s32.totalorder %s980_s5, %s656_s18 }
  0x67   : > { %p654_p3 = pneg %p653_p7  ;;  %p659_p11 = scmp.lt.s32.totalorder %s657_s24, %s651_s3 }
  0x69   : > { %v588_v7 = vpop.eup %587  ;;  %p660_p1 = por %p659_p11, %p658_p10 }
  0x6a   : > { %v269_v9 = vmul.f32 0.5, %v588_v7  ;;  %v274_v10 = vand.u32 2147483647, %v588_v7 }
  0x6b   : > { %p661_p2 = pnand %p660_p1, %p654_p3 }
  0x6c   : > { %v270_v12 = vadd.f32 0.5, %v269_v9  ;;  %v275_v14 = vmul.f32 0.5, %v274_v10 }
  0x6e   : > { %v285_v16 = vmul.f32 %v270_v12, %v256_v11  ;;  %v290_v17 = vmul.f32 %v270_v12, %v270_v12  ;;  %v276_v18 = vadd.f32 0.5, %v275_v14 }
  0x70   : > { %v286_v19 = vsel %vm266_vm0, %v285_v16, 0.0  ;;  %v292_v21 = vadd.f32 %v291_v13, %v290_v17  ;;  %589 = vlog2.f32 %v276_v18 }
  0x71   : > { %v287_v22 = vadd.f32 %v286_v19, %v284_v15 }
  0x72   : > { %v293_v23 = vsel %vm266_vm0, %v292_v21, 0.0 }
  0x73   : > { %288 = vst [vmem:[#allocation3] sm:$0x3] %v287_v22  ;;  %v294_v24 = vadd.f32 %v293_v23, %v289_v20 }
  0x75   : > { %295 = vst [vmem:[#allocation4] sm:$0x3] %v294_v24 }
  0x7a   : > { %v590_v28 = vpop.eup %589  ;;  %v298_v29 = vld [vmem:[#allocation3] sm:$0x3] }
  0x7b   : > { %v300_v30 = vsel %vm299_vm1, %v298_v29, 0.0  ;;  %v278_v31 = vmul.f32 0.6931472, %v590_v28 }
  0x7c   : > { %301 = vadd.xlane.f32.xlu0 %v300_v30  ;;  %v310_v32 = vld [vmem:[#allocation4] sm:$0x3] }
  0x7d   : > { %v311_v33 = vsel %vm299_vm1, %v310_v32, 0.0  ;;  %v279_v34 = vsub.f32 %v273_v27, %v278_v31 }
  0x7f   : > { %v281_v36 = vsel %vm266_vm0, %v279_v34, 0.0 }
  0x80   : > { %312 = vadd.xlane.f32.xlu0 %v311_v33  ;;  %v282_v37 = vadd.f32 %v281_v36, %v280_v35 }
  0x82   : > { %283 = vst [vmem:[#allocation2] sm:$0x3] %v282_v37 }
  0x89   : > { %v321_v38 = vld [vmem:[#allocation2] sm:$0x3] }
  0x8a   : > { %v322_v39 = vsel %vm299_vm1, %v321_v38, 0.0 }
  0x8b   : > { %323 = vadd.xlane.f32.xlu1 %v322_v39 }
 0x109   : > { %v302_v40 = vpop.xlane.xlu0 %301 }
 0x10a   : > { %v303_v41 = vrot.slane %v302_v40, 4 }
 0x10c   : > { %v304_v42 = vadd.f32 %v303_v41, %v302_v40 }
 0x10d   : > { %v313_v43 = vpop.xlane.xlu0 %312 }
 0x10e   : > { %v305_v44 = vrot.slane %v304_v42, 2  ;;  %v314_v45 = vrot.slane %v313_v43, 4 }
 0x110   : > { %v315_v46 = vadd.f32 %v314_v45, %v313_v43  ;;  %v306_v47 = vadd.f32 %v305_v44, %v304_v42 }
 0x112   : > { %v316_v48 = vrot.slane %v315_v46, 2  ;;  %v307_v49 = vrot.slane %v306_v47, 1 }
 0x114   : > { %v317_v50 = vadd.f32 %v316_v48, %v315_v46  ;;  %v308_v51 = vadd.f32 %v307_v49, %v306_v47 }
 0x116   : > { %497 = vpush %v308_v51  ;;  %v318_v52 = vrot.slane %v317_v50, 1 }
 0x118   : > { %v324_v53 = vpop.xlane.xlu1 %323  ;;  %v319_v54 = vadd.f32 %v318_v52, %v317_v50 }
 0x119   : > { %v325_v55 = vrot.slane %v324_v53, 4 }
 0x11a   : > { %499 = vpush %v319_v54 }
 0x11b   : > { %v326_v56 = vadd.f32 %v325_v55, %v324_v53 }
 0x11d   : > { %v327_v57 = vrot.slane %v326_v56, 2 }
 0x11f   : > { %v328_v58 = vadd.f32 %v327_v57, %v326_v56 }
 0x121   : > { %v329_v59 = vrot.slane %v328_v58, 1 }
 0x123   : > { %v330_v60 = vadd.f32 %v329_v59, %v328_v58 }
 0x125   : > { %501 = vpush %v330_v60 }
 0x147   : > { %s498_s7 = spop %497 }
 0x148   : > { %v339_v0 = vstv %s498_s7 }
 0x14b   : > { %s500_s6 = spop %499 }
 0x14c   : > { %v337_v62 = vstv %s500_s6 }
 0x156   : > { %s502_s23 = spop %501 }
 0x157   : > { %v335_v61 = vstv %s502_s23 }
 0x158   : > { %v336_v63 = vsel %vm334_vm2, %v335_v61, 0.0 }
 0x159   : > { %v338_v1 = vsel %vm333_vm3, %v337_v62, %v336_v63 }
 0x15a   : > { %v340_v2 = vsel %vm332_vm4, %v339_v0, %v338_v1 }
 0x15b   : > { %341 = vst [vmem:[%s243_s4] sm:$0xff] %v340_v2 }
 0x15c   : > { %664 = shalt.err (!%p661_p2)
}
 0x15d   : > { %s665_s22 = scalar_lea.hbm %s978_s26, 128  ;;  %s669_s7 = scalar_lea.hbm %s1034_s2, 1024 }
 0x15e   : > { %p666_p9 = scmp.ne.s32.totalorder %s978_s26, %s665_s22  ;;  %p670_p6 = scmp.lt.u32.totalorder %s978_s26, %s1034_s2 }
 0x15f   : > { %p671_p13 = scmp.lt.u32.totalorder %s669_s7, %s665_s22  ;;  %p673_p8 = scmp.lt.u32.totalorder %s665_s22, %s978_s26 }
 0x160   : > { %p667_p12 = pnand %p666_p9, %p1049_p0 }
 0x161   : > { %p672_p5 = por %p671_p13, %p670_p6 }
 0x162   : > { %p668_p4 = pneg %p667_p12 }
 0x163   : > { %p674_p7 = por %p673_p8, %p672_p5 }
 0x165   : > { %p675_p3 = pnand %p674_p7, %p668_p4 }
 0x167   : > { %678 = shalt.err (!%p675_p3)
}
 0x168   : > { %507 = dma.vmem_to_hbm [thread:$0]  (%p1049_p0), %s980_s5, 128, %s978_s26, %s343_s8  }
 0x169 PF: > { %p521_p10 = scmp.ge.s32.totalorder %s753_s16, 2  ;;  %s370_s23 = sand.u32 1, %s725_s9  }
 0x16a   : > { %p1050_p11 = scmp.ne.s32.totalorder %s1041_s28, 0  ;;  %s371_s4 = scalar_lea.sflag [#allocation7], %s370_s23 }
 0x16c   : > { %p517_p1 = pnand %p521_p10, %p1050_p11 }
 0x16e   : > { %720 = dma.done.wait (!%p517_p1), %s371_s4, 128  }
 0x16f   : > { %722 = vsyncadd (!%p517_p1), %s371_s4, 4294967168  ;;  %s21_s16 = sadd.s32 1, %s753_s16   ;;  %s1051_s9 = smov %s729_s10 }
 0x170   : > { %p18_p2 = scmp.ge.s32.totalorder %s21_s16, 10   ;;  %s1052_s10 = smov %s733_s11 }
 0x171   : > { %s1053_s11 = smov %s854_s30  ;;  %s1054_s12 = smov %s745_s14 }
 0x172   : > { %s1055_s13 = smov %s749_s15  ;;  %s1056_s14 = smov %s1059_s19 }
 0x173   : > { %s1057_s15 = smov %s1063_s20  ;;  %20 = sbr.rel (!%p18_p2) target bundleno = 9 (0x9), region = 94 }
 0x17a   :  { %376 = vsyncpa [#allocation6], 1 }
 0x17b   :  { %378 = vsyncpa [#allocation6 + $0x1], 1 }
 0x17c   :  { %379 = vsyncpa [#allocation9], 1 }
 0x17d   :  { %381 = vsyncpa [#allocation9 + $0x1], 1 }
 0x17e   :  { %382 = vsyncpa [#allocation7], 1 }
 0x17f   :  { %384 = vsyncpa [#allocation7 + $0x1], 1 }

</bundles_post_ra>
